<compile_context>
chip_gen: v6e
topology: v6e:2x2x1
jax: 0.10.0
libtpu: 0.0.40
codegen_flags: <defaults>
</compile_context>

<pallas_src>
import math

import jax
import jax.numpy as jnp
from jax.experimental import pallas as pl
from jax.experimental.pallas import tpu as pltpu

EPS = 1e-8


def _image_embedding_kernel(x_ref,       # (Bt, K, D)   image features
                            qfa_ref,     # (Bt, 1, H)   hoisted ReLU(q @ Wq + bq)
                            locs_ref,    # (Bt, 1, 1)   valid #locations (int32)
                            wi_ref,      # (D, H)
                            bi_ref,      # (1, H)
                            wt_ref,      # (H, A)
                            bt_ref,      # (1, A)
                            emb_ref,     # out: (Bt, A, D)
                            att_ref):    # out: (Bt, K, A)
    Bt, K, D = x_ref.shape
    H = wi_ref.shape[1]
    A = wt_ref.shape[1]

    x = x_ref[...]                                        # (Bt, K, D)
    x_rows = x.reshape(Bt * K, D)                         # all block rows -> MXU rows

    # Image branch: ReLU(x @ Wi + bi) as a single (Bt*K, D) @ (D, H) matmul.
    img_fa = jnp.maximum(
        jnp.dot(x_rows, wi_ref[...], preferred_element_type=jnp.float32)
        + bi_ref[...].astype(jnp.float32),
        0.0)                                              # (Bt*K, H) f32

    # Element-wise combine with the pre-computed question features.
    joint = img_fa.reshape(Bt, K, H) * qfa_ref[...].astype(jnp.float32)  # (Bt, K, H)

    # LinearTransform -> raw attention logits, again one big matmul.
    raw = (jnp.dot(joint.reshape(Bt * K, H).astype(wt_ref.dtype), wt_ref[...],
                   preferred_element_type=jnp.float32)
           + bt_ref[...].astype(jnp.float32)).reshape(Bt, K, A)          # (Bt, K, A)

    # Softmax over locations with the validity mask fused in.  Exactly equal
    # (up to fp rounding) to: softmax -> zero invalid rows -> divide by
    # (sum + (sum==0) + EPS), because the unmasked denominator cancels:
    #   out = e_valid / (s_valid + ((s_valid==0) + EPS) * sum(e))
    m = jnp.max(raw, axis=1, keepdims=True)               # (Bt, 1, A)
    e = jnp.exp(raw - m)                                  # (Bt, K, A)
    e_total = jnp.sum(e, axis=1, keepdims=True)           # (Bt, 1, A)

    k_idx = jax.lax.broadcasted_iota(jnp.int32, (Bt, K, A), 1)
    loc = locs_ref[...]                                   # (Bt, 1, 1) int32
    e_valid = jnp.where(k_idx >= loc, 0.0, e)             # (Bt, K, A)
    s_valid = jnp.sum(e_valid, axis=1, keepdims=True)     # (Bt, 1, A)
    denom = s_valid + ((s_valid == 0.0).astype(jnp.float32) + EPS) * e_total
    att = e_valid * pl.reciprocal(denom, approx=False)    # (Bt, K, A)

    # bmm(att^T, image_feat): batched contraction over K, no explicit transpose.
    emb = jax.lax.dot_general(
        att.astype(x_ref.dtype), x,
        dimension_numbers=(((1,), (1,)), ((0,), (0,))),
        preferred_element_type=jnp.float32)               # (Bt, A, D)

    emb_ref[...] = emb.astype(emb_ref.dtype)
    att_ref[...] = att.astype(att_ref.dtype)


def _pick_block_batch(B, K, target_rows=256):
    """Smallest divisor of B giving at least `target_rows` MXU rows per step."""
    want = min(B, max(1, -(-target_rows // K)))
    for cand in range(want, B + 1):
        if B % cand == 0:
            return cand
    return B


def image_embedding_forward(image_feat, question_emb, image_dims, params,
                            *, block_batch=None, compute_dtype=None):
    """image_feat: [B,K,D]; question_emb: [B,Dq]; image_dims: [B] int.

    Returns (image_embedding [B, A*D], attention [B, K, A]) like the torch module.
    compute_dtype=jnp.bfloat16 casts matmul operands for native MXU rate at
    production sizes (accumulation stays f32).
    """
    B, K, D = image_feat.shape
    H = params["wi_t"].shape[1]
    A = params["wt_t"].shape[1]

    # Question branch hoisted to plain XLA (tiny [B,Dq]@[Dq,H]); keeps Wq out of VMEM.
    q_fa = jax.nn.relu(question_emb @ params["wq_t"] + params["bq"])      # (B, H)

    x, wi, wt = image_feat, params["wi_t"], params["wt_t"]
    if compute_dtype is not None:
        x, q_fa, wi, wt = (a.astype(compute_dtype) for a in (x, q_fa, wi, wt))

    if block_batch is None:
        block_batch = _pick_block_batch(B, K)
    Bt = block_batch
    assert B % Bt == 0, "block_batch must divide the batch size"

    q3 = q_fa.reshape(B, 1, H)                      # (Bt,1,H) blocks: full last-2 dims
    locs = image_dims.reshape(B, 1, 1).astype(jnp.int32)

    isz = jnp.dtype(x.dtype).itemsize
    wsz = jnp.dtype(wi.dtype).itemsize
    # Double-buffered per-step blocks + (double-buffered) resident weights + slack.
    block_bytes = 2 * (Bt * K * D * isz + Bt * H * isz + Bt * 4
                       + Bt * A * D * 4 + Bt * K * A * 4)
    weight_bytes = 2 * (D * H * wsz + H * 4 + H * A * wsz + A * 4)
    vmem_limit = int(min(max(block_bytes + weight_bytes + (8 << 20), 32 << 20),
                         100 << 20))

    flops = 2 * B * K * D * H + 2 * B * K * H * A + 2 * B * A * K * D
    bytes_accessed = (B * K * D * isz + B * H * isz + B * 4
                      + D * H * wsz + H * 4 + H * A * wsz + A * 4
                      + B * A * D * 4 + B * K * A * 4)
    cost = pl.CostEstimate(flops=int(flops), transcendentals=int(B * K * A),
                           bytes_accessed=int(bytes_accessed))

    emb, att = pl.pallas_call(
        _image_embedding_kernel,
        grid=(B // Bt,),
        in_specs=[
            pl.BlockSpec((Bt, K, D), lambda g: (g, 0, 0)),
            pl.BlockSpec((Bt, 1, H), lambda g: (g, 0, 0)),
            pl.BlockSpec((Bt, 1, 1), lambda g: (g, 0, 0)),
            pl.BlockSpec((D, H),     lambda g: (0, 0)),
            pl.BlockSpec((1, H),     lambda g: (0, 0)),
            pl.BlockSpec((H, A),     lambda g: (0, 0)),
            pl.BlockSpec((1, A),     lambda g: (0, 0)),
        ],
        out_specs=[
            pl.BlockSpec((Bt, A, D), lambda g: (g, 0, 0)),
            pl.BlockSpec((Bt, K, A), lambda g: (g, 0, 0)),
        ],
        out_shape=(jax.ShapeDtypeStruct((B, A, D), jnp.float32),
                   jax.ShapeDtypeStruct((B, K, A), jnp.float32)),
        compiler_params=pltpu.CompilerParams(
            dimension_semantics=("parallel",),   # batch steps independent -> megacore
            vmem_limit_bytes=vmem_limit),
        cost_estimate=cost,
    )(x, q3, locs, wi, params["bi"], wt, params["bt"])

    # (B, A, D) -> (B, A*D) is contiguous: metadata-only reshape in XLA.
    return emb.reshape(B, A * D), att


def make_params(key, img_dim, q_dim, hidden_dim, num_attn):
    """Deterministic synthetic params; weight_norm folded into effective weights."""
    ks = jax.random.split(key, 6)
    # ReLUWithWeightNormFC(img_dim -> hidden): weight_norm dim=0 (per-output-row)
    vi = jax.random.normal(ks[0], (hidden_dim, img_dim), jnp.float32) * 0.05
    wi = vi / jnp.linalg.norm(vi, axis=1, keepdims=True)
    bi = jax.random.normal(ks[1], (1, hidden_dim), jnp.float32) * 0.01
    # ReLUWithWeightNormFC(q_dim -> hidden)
    vq = jax.random.normal(ks[2], (hidden_dim, q_dim), jnp.float32) * 0.05
    wq = vq / jnp.linalg.norm(vq, axis=1, keepdims=True)
    bq = jax.random.normal(ks[3], (1, hidden_dim), jnp.float32) * 0.01
    # LinearTransform(hidden -> num_attn): weight_norm dim=None (global norm)
    vt = jax.random.normal(ks[4], (num_attn, hidden_dim), jnp.float32) * 0.05
    wt = vt / jnp.linalg.norm(vt)
    bt = jax.random.normal(ks[5], (1, num_attn), jnp.float32) * 0.01
    return {
        "wi_t": wi.T, "bi": bi,      # [D,H], [1,H]
        "wq_t": wq.T, "bq": bq,      # [Dq,H], [1,H]
        "wt_t": wt.T, "bt": bt,      # [H,A], [1,A]
    }


def _reference(image_feat, question_emb, image_dims, p):
    """Pure-JAX reference mirroring the PyTorch forward (eval mode)."""
    B, K, D = image_feat.shape
    img_fa = jax.nn.relu(image_feat @ p["wi_t"] + p["bi"])
    q_fa = jax.nn.relu(question_emb @ p["wq_t"] + p["bq"][0])
    joint = img_fa * q_fa[:, None, :]
    raw = joint @ p["wt_t"] + p["bt"]
    att = jax.nn.softmax(raw, axis=1)
    k_idx = jnp.arange(K)[None, :, None]
    masked = jnp.where(k_idx >= image_dims[:, None, None], 0.0, att)
    s = jnp.sum(masked, axis=1, keepdims=True)
    s = s + (s == 0.0).astype(jnp.float32) + EPS
    masked = masked / s
    emb = jnp.einsum("bka,bkd->bad", masked, image_feat)
    return emb.reshape(B, -1), masked


if __name__ == "__main__":
    # batch, num_locations, img_feat_dim, q_dim, hidden, glimpses
    B, K, D, Dq, H, A = 16, 8, 32, 16, 32, 2

    key = jax.random.PRNGKey(0)
    k_x, k_q, k_l, k_p = jax.random.split(key, 4)
    image_feat = jax.random.normal(k_x, (B, K, D), jnp.float32)
    question_emb = jax.random.normal(k_q, (B, Dq), jnp.float32)
    image_dims = jax.random.randint(k_l, (B,), 1, K + 1).astype(jnp.int32)

    params = make_params(k_p, D, Dq, H, A)

    # block_batch=8 -> grid=(2,), 64 feature rows per MXU call per step.
    emb, att = image_embedding_forward(image_feat, question_emb, image_dims, params,
                                       block_batch=8)
    jax.block_until_ready((emb, att))

    ref_emb, ref_att = _reference(image_feat, question_emb, image_dims, params)
    assert emb.shape == (B, A * D) and att.shape == (B, K, A)
    assert jnp.allclose(emb, ref_emb, atol=1e-5, rtol=1e-5)
    assert jnp.allclose(att, ref_att, atol=1e-5, rtol=1e-5)

    print("KERNEL_OK")
</pallas_src>

<mosaic_0001>
module attributes {stable_mosaic.version = 11 : i64} {
  func.func @_image_embedding_kernel(%arg0: i32, %arg1: memref<8x8x32xf32, #tpu.memory_space<vmem>>, %arg2: memref<8x1x32xf32, #tpu.memory_space<vmem>>, %arg3: memref<8x1x1xi32, #tpu.memory_space<vmem>>, %arg4: memref<32x32xf32, #tpu.memory_space<vmem>>, %arg5: memref<1x32xf32, #tpu.memory_space<vmem>>, %arg6: memref<32x2xf32, #tpu.memory_space<vmem>>, %arg7: memref<1x2xf32, #tpu.memory_space<vmem>>, %arg8: memref<8x2x32xf32, #tpu.memory_space<vmem>>, %arg9: memref<8x8x2xf32, #tpu.memory_space<vmem>>) attributes {dimension_semantics = [#tpu.dimension_semantics<parallel>], iteration_bounds = array<i64: 2>, scalar_prefetch = 0 : i64, scratch_operands = 0 : i64, tpu.core_type = #tpu.core_type<tc>, window_params = [{transform_indices = @transform_0, window_bounds = array<i64: 8, 8, 32>}, {transform_indices = @transform_1, window_bounds = array<i64: 8, 1, 32>}, {transform_indices = @transform_2, window_bounds = array<i64: 8, 1, 1>}, {pipeline_mode = #tpu.pipeline_mode<synchronous>, transform_indices = @transform_3, window_bounds = array<i64: 32, 32>}, {pipeline_mode = #tpu.pipeline_mode<synchronous>, transform_indices = @transform_4, window_bounds = array<i64: 1, 32>}, {pipeline_mode = #tpu.pipeline_mode<synchronous>, transform_indices = @transform_5, window_bounds = array<i64: 32, 2>}, {pipeline_mode = #tpu.pipeline_mode<synchronous>, transform_indices = @transform_6, window_bounds = array<i64: 1, 2>}, {transform_indices = @transform_7, window_bounds = array<i64: 8, 2, 32>}, {transform_indices = @transform_8, window_bounds = array<i64: 8, 8, 2>}]} {
    %c0 = arith.constant 0 : index
    %c0_0 = arith.constant 0 : index
    %c0_1 = arith.constant 0 : index
    %0 = vector.load %arg1[%c0, %c0_0, %c0_1] : memref<8x8x32xf32, #tpu.memory_space<vmem>>, vector<8x8x32xf32>
    %1 = vector.shape_cast %0 : vector<8x8x32xf32> to vector<64x32xf32>
    %c0_2 = arith.constant 0 : index
    %c0_3 = arith.constant 0 : index
    %2 = vector.load %arg4[%c0_2, %c0_3] : memref<32x32xf32, #tpu.memory_space<vmem>>, vector<32x32xf32>
    %cst = arith.constant dense<0.000000e+00> : vector<64x32xf32>
    %3 = tpu.matmul %1, %2, %cst {dimension_numbers = #tpu.dot_dimension_numbers<[1], [0], [0], [1], [0, 0, 1, 1], [], []>} : vector<64x32xf32>, vector<32x32xf32>, vector<64x32xf32> -> vector<64x32xf32>
    %c0_4 = arith.constant 0 : index
    %c0_5 = arith.constant 0 : index
    %4 = vector.load %arg5[%c0_4, %c0_5] : memref<1x32xf32, #tpu.memory_space<vmem>>, vector<1x32xf32>
    %5 = vector.broadcast %4 : vector<1x32xf32> to vector<64x32xf32>
    %6 = arith.addf %3, %5 : vector<64x32xf32>
    %cst_6 = arith.constant 0.000000e+00 : f32
    %7 = vector.broadcast %cst_6 : f32 to vector<64x32xf32>
    %8 = arith.maximumf %6, %7 : vector<64x32xf32>
    %9 = vector.shape_cast %8 : vector<64x32xf32> to vector<8x8x32xf32>
    %c0_7 = arith.constant 0 : index
    %c0_8 = arith.constant 0 : index
    %c0_9 = arith.constant 0 : index
    %10 = vector.load %arg2[%c0_7, %c0_8, %c0_9] : memref<8x1x32xf32, #tpu.memory_space<vmem>>, vector<8x1x32xf32>
    %11 = vector.broadcast %10 : vector<8x1x32xf32> to vector<8x8x32xf32>
    %12 = arith.mulf %9, %11 : vector<8x8x32xf32>
    %13 = vector.shape_cast %12 : vector<8x8x32xf32> to vector<64x32xf32>
    %c0_10 = arith.constant 0 : index
    %c0_11 = arith.constant 0 : index
    %14 = vector.load %arg6[%c0_10, %c0_11] : memref<32x2xf32, #tpu.memory_space<vmem>>, vector<32x2xf32>
    %cst_12 = arith.constant dense<0.000000e+00> : vector<64x2xf32>
    %15 = tpu.matmul %13, %14, %cst_12 {dimension_numbers = #tpu.dot_dimension_numbers<[1], [0], [0], [1], [0, 0, 1, 1], [], []>} : vector<64x32xf32>, vector<32x2xf32>, vector<64x2xf32> -> vector<64x2xf32>
    %c0_13 = arith.constant 0 : index
    %c0_14 = arith.constant 0 : index
    %16 = vector.load %arg7[%c0_13, %c0_14] : memref<1x2xf32, #tpu.memory_space<vmem>>, vector<1x2xf32>
    %17 = vector.broadcast %16 : vector<1x2xf32> to vector<64x2xf32>
    %18 = arith.addf %15, %17 : vector<64x2xf32>
    %19 = vector.shape_cast %18 : vector<64x2xf32> to vector<8x8x2xf32>
    %cst_15 = arith.constant dense<0xFF800000> : vector<8x2xf32>
    %20 = vector.multi_reduction <maximumf>, %19, %cst_15 [1] : vector<8x8x2xf32> to vector<8x2xf32>
    %21 = vector.shape_cast %20 : vector<8x2xf32> to vector<8x1x2xf32>
    %22 = vector.broadcast %21 : vector<8x1x2xf32> to vector<8x8x2xf32>
    %23 = arith.subf %19, %22 : vector<8x8x2xf32>
    %24 = math.exp %23 : vector<8x8x2xf32>
    %cst_16 = arith.constant dense<0.000000e+00> : vector<8x2xf32>
    %25 = vector.multi_reduction <add>, %24, %cst_16 [1] : vector<8x8x2xf32> to vector<8x2xf32>
    %26 = vector.shape_cast %25 : vector<8x2xf32> to vector<8x1x2xf32>
    %27 = tpu.iota {dimensions = array<i32: 1>} : vector<8x8x2xi32>
    %c0_17 = arith.constant 0 : index
    %c0_18 = arith.constant 0 : index
    %c0_19 = arith.constant 0 : index
    %28 = vector.load %arg3[%c0_17, %c0_18, %c0_19] : memref<8x1x1xi32, #tpu.memory_space<vmem>>, vector<8x1x1xi32>
    %29 = vector.broadcast %28 : vector<8x1x1xi32> to vector<8x8x2xi32>
    %30 = arith.cmpi sge, %27, %29 : vector<8x8x2xi32>
    %cst_20 = arith.constant 0.000000e+00 : f32
    %31 = vector.broadcast %cst_20 : f32 to vector<8x8x2xf32>
    %32 = arith.select %30, %31, %24 : vector<8x8x2xi1>, vector<8x8x2xf32>
    %cst_21 = arith.constant dense<0.000000e+00> : vector<8x2xf32>
    %33 = vector.multi_reduction <add>, %32, %cst_21 [1] : vector<8x8x2xf32> to vector<8x2xf32>
    %34 = vector.shape_cast %33 : vector<8x2xf32> to vector<8x1x2xf32>
    %cst_22 = arith.constant 0.000000e+00 : f32
    %35 = vector.broadcast %cst_22 : f32 to vector<8x1x2xf32>
    %36 = arith.cmpf oeq, %34, %35 : vector<8x1x2xf32>
    %37 = arith.extui %36 : vector<8x1x2xi1> to vector<8x1x2xi32>
    %38 = arith.sitofp %37 : vector<8x1x2xi32> to vector<8x1x2xf32>
    %cst_23 = arith.constant 9.99999993E-9 : f32
    %39 = vector.broadcast %cst_23 : f32 to vector<8x1x2xf32>
    %40 = arith.addf %38, %39 : vector<8x1x2xf32>
    %41 = arith.mulf %40, %26 : vector<8x1x2xf32>
    %42 = arith.addf %34, %41 : vector<8x1x2xf32>
    %43 = tpu.reciprocal %42 : vector<8x1x2xf32> -> vector<8x1x2xf32>
    %44 = vector.broadcast %43 : vector<8x1x2xf32> to vector<8x8x2xf32>
    %45 = arith.mulf %32, %44 : vector<8x8x2xf32>
    %cst_24 = arith.constant dense<0.000000e+00> : vector<8x2x32xf32>
    %46 = tpu.matmul %45, %0, %cst_24 {dimension_numbers = #tpu.dot_dimension_numbers<[1], [1], [2], [2], [0, 0, 0, 2, 1, 2], [0], [0]>} : vector<8x8x2xf32>, vector<8x8x32xf32>, vector<8x2x32xf32> -> vector<8x2x32xf32>
    %c0_25 = arith.constant 0 : index
    %c0_26 = arith.constant 0 : index
    %c0_27 = arith.constant 0 : index
    %47 = vector.load %arg8[%c0_25, %c0_26, %c0_27] : memref<8x2x32xf32, #tpu.memory_space<vmem>>, vector<8x2x32xf32>
    tpu.vector_store %arg8[%c0_25, %c0_26, %c0_27], %46 {strides = array<i32>} : memref<8x2x32xf32, #tpu.memory_space<vmem>>, vector<8x2x32xf32>,
    %c0_28 = arith.constant 0 : index
    %c0_29 = arith.constant 0 : index
    %c0_30 = arith.constant 0 : index
    %48 = vector.load %arg9[%c0_28, %c0_29, %c0_30] : memref<8x8x2xf32, #tpu.memory_space<vmem>>, vector<8x8x2xf32>
    tpu.vector_store %arg9[%c0_28, %c0_29, %c0_30], %45 {strides = array<i32>} : memref<8x8x2xf32, #tpu.memory_space<vmem>>, vector<8x8x2xf32>,
    return
  }
  func.func @transform_0(%arg0: i32) -> (i32, i32, i32) {
    %c0_i32 = arith.constant 0 : i32
    %c0_i32_0 = arith.constant 0 : i32
    %c0_i32_1 = arith.constant 0 : i32
    return %arg0, %c0_i32, %c0_i32_0 : i32, i32, i32
  }
  func.func @transform_1(%arg0: i32) -> (i32, i32, i32) {
    %c0_i32 = arith.constant 0 : i32
    %c0_i32_0 = arith.constant 0 : i32
    %c0_i32_1 = arith.constant 0 : i32
    return %arg0, %c0_i32, %c0_i32_0 : i32, i32, i32
  }
  func.func @transform_2(%arg0: i32) -> (i32, i32, i32) {
    %c0_i32 = arith.constant 0 : i32
    %c0_i32_0 = arith.constant 0 : i32
    %c0_i32_1 = arith.constant 0 : i32
    return %arg0, %c0_i32, %c0_i32_0 : i32, i32, i32
  }
  func.func @transform_3(%arg0: i32) -> (i32, i32) {
    %c0_i32 = arith.constant 0 : i32
    %c0_i32_0 = arith.constant 0 : i32
    %c0_i32_1 = arith.constant 0 : i32
    return %c0_i32, %c0_i32_0 : i32, i32
  }
  func.func @transform_4(%arg0: i32) -> (i32, i32) {
    %c0_i32 = arith.constant 0 : i32
    %c0_i32_0 = arith.constant 0 : i32
    %c0_i32_1 = arith.constant 0 : i32
    return %c0_i32, %c0_i32_0 : i32, i32
  }
  func.func @transform_5(%arg0: i32) -> (i32, i32) {
    %c0_i32 = arith.constant 0 : i32
    %c0_i32_0 = arith.constant 0 : i32
    %c0_i32_1 = arith.constant 0 : i32
    return %c0_i32, %c0_i32_0 : i32, i32
  }
  func.func @transform_6(%arg0: i32) -> (i32, i32) {
    %c0_i32 = arith.constant 0 : i32
    %c0_i32_0 = arith.constant 0 : i32
    %c0_i32_1 = arith.constant 0 : i32
    return %c0_i32, %c0_i32_0 : i32, i32
  }
  func.func @transform_7(%arg0: i32) -> (i32, i32, i32) {
    %c0_i32 = arith.constant 0 : i32
    %c0_i32_0 = arith.constant 0 : i32
    %c0_i32_1 = arith.constant 0 : i32
    return %arg0, %c0_i32, %c0_i32_0 : i32, i32, i32
  }
  func.func @transform_8(%arg0: i32) -> (i32, i32, i32) {
    %c0_i32 = arith.constant 0 : i32
    %c0_i32_0 = arith.constant 0 : i32
    %c0_i32_1 = arith.constant 0 : i32
    return %arg0, %c0_i32, %c0_i32_0 : i32, i32, i32
  }
}

</mosaic_0001>

<bundles_post_ra>
// kernel: tpu_custom_call.1
= control target key start
LH: loop header
LB: loop body
LE: loop exit
PB: predicated region body
PF: predicated region fallthrough
CT: control target
= control target key end

     0   :  { %14 = vsyncpa [#allocation3], 0  ;;  %s2926_s0 = inlined_call_operand.hbm [shape: f32[16,8,32], index: 0, kind: input, shape index: {}]   ;;  %s2927_s1 = inlined_call_operand.vmem [shape: f32[16,1,32], index: 1, kind: input, shape index: {}]   ;;  %s2928_s2 = inlined_call_operand.vmem [shape: s32[16,1,1], index: 2, kind: input, shape index: {}]   ;;  %s2929_s3 = inlined_call_operand.vmem [shape: f32[32,32], index: 3, kind: input, shape index: {}]   ;;  %s2930_s4 = inlined_call_operand.vmem [shape: f32[1,32], index: 4, kind: input, shape index: {}]   ;;  %s2931_s5 = inlined_call_operand.vmem [shape: f32[32,2], index: 5, kind: input, shape index: {}]   ;;  %s2932_s6 = inlined_call_operand.vmem [shape: f32[1,2], index: 6, kind: input, shape index: {}]   ;;  %s2933_s7 = inlined_call_operand.hbm [shape: f32[16,2,32], index: 7, kind: output, shape index: {0}]   ;;  %s2934_s8 = inlined_call_operand.vmem [shape: f32[16,8,2], index: 8, kind: output, shape index: {1}]  }
   0x1   :  { %16 = vsyncpa [#allocation3 + $0x1], 0 }
   0x2   :  { %17 = vsyncpa [#allocation4], 0 }
   0x3   :  { %19 = vsyncpa [#allocation4 + $0x1], 0  ;;  %s2500_s27 = smov 0   ;;  %s2502_s28 = smov 0  }
   0x4   :  { %s2504_s29 = smov 0   ;;  %s2506_s30 = smov 0  }
   0x5 LB: > { %s2521_s9 = sadd.s32 4294967295, %s2444_s30   ;;  %s2075_s10 = sadd.s32 4294967294, %s2444_s30   ;;  %s2444_s30 = sphi %s2506_s30, %s2951_s30   ;;  %s2440_s29 = sphi %s2504_s29, %s2950_s29   ;;  %s2436_s28 = sphi %s2502_s28, %s2949_s28   ;;  %s2432_s27 = sphi %s2500_s27, %s2948_s27  }
   0x6   : > { %s2525_s11 = sadd.s32 1, %s2444_s30   ;;  %s32_s12 = sadd.s32 1, %s2440_s29 }
   0x7   : > { %s29_s13 = ssub.s32 %s2444_s30, %s2525_s11  ;;  %p39_p0 = scmp.ne.s32.totalorder %s2440_s29, %s2436_s28 }
   0x8   : > { %p30_p1 = scmp.eq.s32.totalorder %s29_s13, 0  ;;  %p40_p2 = scmp.eq.s32.totalorder %s2444_s30, 0 }
   0x9   : > { %p45_p3 = scmp.ne.s32.totalorder %s2436_s28, %s2432_s27  ;;  %p46_p4 = scmp.eq.s32.totalorder %s2521_s9, 0 }
   0xa   : > { %s2537_s14 = scalar_select %p30_p1, %s2440_s29, %s32_s12  }
   0xb   : > { %p2539_p5 = por %p40_p2, %p39_p0  ;;  %p2543_p6 = por %p46_p4, %p45_p3 }
   0xc   : > { %2937 = sst [smem:[#allocation8_spill]] %s2537_s14  ;;  %p205_p7 = scmp.eq.s32.totalorder %s2521_s9, 1 }
   0xd   : > { %s2939_s16 = scalar_select %p2543_p6, 1, 0 }
   0xe   : > { %p211_p8 = scmp.eq.s32.totalorder %s2075_s10, 1  ;;  %p2277_p10 = scmp.lt.s32.totalorder %s2444_s30, 2 }
   0xf   : > { %p2550_p11 = por %p205_p7, %p39_p0  ;;  %s269_s19 = sand.u32 1, %s2440_s29  }
  0x10   : > { %p2554_p12 = por %p211_p8, %p45_p3  ;;  %s2143_s20 = sshll.u32 %s2444_s30, 10 }
  0x11   : > { %s2940_s17 = scalar_select %p2550_p11, 1, 0 }
  0x12   : > { %s2941_s18 = scalar_select %p2554_p12, 1, 0 }
  0x13   : > { %s2078_s21 = sshll.u32 %s269_s19, 6  ;;  %s2563_s24 = scalar_lea.hbm %s2926_s0, %s2143_s20 }
  0x14   : > { %s273_s25 = scalar_lea.vmem [#allocation2], %s2078_s21  ;;  %p2567_p13 = pnand %p2277_p10, %p2539_p5 }
  0x15   : > { %s280_s26 = sshll.u32 %s273_s25, 4  ;;  %s2573_s12 = scalar_lea.sflag [#allocation3], %s269_s19  ;;  %s2571_s26 = int_to_ptr.vmem [resolvable:$true] %s280_s26 }
  0x16   : > { %s2352_s13 = scalar_lea.hbm %s2563_s24, 1024  ;;  %p2354_p1 = pneg %p2567_p13 }
  0x17   : > { %p2353_p0 = scmp.ne.s32.totalorder %s2563_s24, %s2352_s13  ;;  %s2357_s21 = scalar_lea.hbm %s2926_s0, 2048 }
  0x18   : > { %p2358_p4 = scmp.lt.s32.totalorder %s2563_s24, %s2926_s0  ;;  %p2359_p5 = scmp.lt.s32.totalorder %s2357_s21, %s2352_s13 }
  0x19   : > { %p2355_p2 = pnand %p2354_p1, %p2353_p0 }
  0x1a   : > { %p2360_p7 = por %p2359_p5, %p2358_p4 }
  0x1b   : > { %p2356_p3 = pneg %p2355_p2 }
  0x1d   : > { %p2361_p8 = pnand %p2360_p7, %p2356_p3 }
  0x1f   : > { %2364 = shalt.err (!%p2361_p8)
}
  0x20   : > { %s2365_s19 = scalar_lea.vmem %s2571_s26, 1024  ;;  %s2446_s25 = smov [#allocation2]  }
  0x21   : > { %p2366_p10 = scmp.ne.s32.totalorder %s2571_s26, %s2365_s19  ;;  %s2370_s14 = sshll.u32 %s2446_s25, 4  ;;  %s2371_s14 = int_to_ptr.vmem [resolvable:$false] %s2370_s14 }
  0x22   : > { %s2372_s20 = scalar_lea.vmem %s2371_s14, 2048  ;;  %p2373_p2 = scmp.lt.s32.totalorder %s2571_s26, %s2371_s14 }
  0x23   : > { %p2368_p9 = pnand %p2366_p10, %p2354_p1  ;;  %p2374_p12 = scmp.lt.s32.totalorder %s2372_s20, %s2365_s19 }
  0x25   : > { %p2369_p0 = pneg %p2368_p9  ;;  %p2375_p11 = por %p2374_p12, %p2373_p2 }
  0x27   : > { %p2376_p6 = pnand %p2375_p11, %p2369_p0 }
  0x29   : > { %2379 = shalt.err (!%p2376_p6)
}
  0x2a   : > { %s2447_s13 = smov 128   ;;  %s2448_s22 = smov 8  }
  0x2b   : > { %2272 = dma.hbm_to_vmem [thread:$0]  (!%p2567_p13), %s2563_s24, 1024, %s2571_s26, %s2573_s12, %s2447_s13, %s2447_s13, %s2448_s22  }
  0x2c   : > { %p2081_p9 = scmp.ge.s32.totalorder %s2444_s30, 1  ;;  %p304_p1 = scmp.lt.s32.totalorder %s2444_s30, 3 }
  0x2e   : > { %p305_p3 = pnand %p2081_p9, %p304_p1 }
  0x2f   : > { %s2597_s14 = sand.u32 (!%p305_p3), 1, %s2436_s28   ;;  %p2943_p6 = scmp.ne.s32.totalorder (!%p305_p3), %s2939_s16, 0 }
  0x30   : > { %308 = sbr.rel (%p305_p3) target bundleno = 891 (0x37b), region = 48  ;;  %s2082_s21 = sshll.u32 (!%p305_p3), %s2597_s14, 6 }
  0x31   : > { %s311_s15 = scalar_lea.sflag (!%p305_p3), [#allocation3], %s2597_s14  ;;  %s314_s23 = scalar_lea.vmem (!%p305_p3), [#allocation2], %s2082_s21 }
  0x35   : > { %2423 = dma.done.wait (%p2943_p6), %s311_s15, 1024  }
  0x36   : > { %2425 = vsyncadd (%p2943_p6), %s311_s15, 4294966272  ;;  %vm397_vm0 = vcmask 261120   ;;  %v389_v0 = vld [vmem:[%s2929_s3 + $0x18] sm:$0xff]  ;;  %v388_v1 = vld [vmem:[%s2929_s3 + $0x10] sm:$0xff]  ;;  %s2084_s12 = sshll.u32 %s2521_s9, 3  ;;  %v2449_v16 = vmov 0  }
  0x37   : > { %2185 = vmatprep.subr.mxu0 %v389_v0  ;;  %v2611_v2 = vld [vmem:[%s314_s23] sm:$0xff]  ;;  %v387_v3 = vld [vmem:[%s2929_s3 + $0x8] sm:$0xff]  ;;  %v2623_v6 = vld [vmem:[%s314_s23 + $0x10] sm:$0xff]  ;;  %p362_p11 = scmp.lt.s32.totalorder %s2084_s12, 15  ;;  %2319 = vset.pattern.permute.xlu1 %v2449_v16  ;;  %vm2451_vm1 = vmmov 0   ;;  %vm739_vm2 = vcmask 15360  }
  0x38   : > { %2186 = vmatpush3.msra.mxu0 %v389_v0  ;;  %2193 = vmatprep.mubr.msk.f32.mxu0 %vm397_vm0, %v2611_v2  ;;  %v386_v4 = vld [vmem:[%s2929_s3] sm:$0xff]  ;;  %v2621_v5 = vld [vmem:[%s314_s23 + $0x8] sm:$0xff]  ;;  %v2629_v7 = vld [vmem:[%s314_s23 + $0x18] sm:$0xff]  ;;  %s2144_s13 = sshll.u32 %s2521_s9, 8  ;;  %s1937_s9 = scalar_lea.sflag [#allocation4], %s2597_s14 }
  0x39   : > { %2187 = vmatprep.subr.mxu0 %v388_v1  ;;  %v2631_v8 = vld [vmem:[%s314_s23 + $0x20] sm:$0xff]  ;;  %v2637_v9 = vld [vmem:[%s314_s23 + $0x28] sm:$0xff]  ;;  %v2639_v10 = vld [vmem:[%s314_s23 + $0x30] sm:$0xff]  ;;  %s2953_s12 = smov (!%p362_p11, %s2084_s12), 15  ;;  %2318 = vset.pattern.permute.xlu0 %v2449_v16  ;;  %p2944_p13 = scmp.ne.s32.totalorder %s2940_s17, 0 }
  0x3a   : > { %2188 = vmatpush3.msra.mxu0 %v388_v1  ;;  %v2645_v11 = vld [vmem:[%s314_s23 + $0x38] sm:$0xff]  ;;  %v601_v13 = vld [vmem:[%s2931_s5 + $0x10] sm:$0xff]  ;;  %v600_v14 = vld [vmem:[%s2931_s5 + $0x8] sm:$0xff]  ;;  %s369_s16 = scalar_lea.vmem %s2928_s2, %s2953_s12  ;;  %s2675_s15 = scalar_lea.vmem %s2927_s1, %s2953_s12 }
  0x3b   : > { %2189 = vmatprep.subr.mxu0 %v387_v3  ;;  %v602_v12 = vld [vmem:[%s2931_s5 + $0x18] sm:$0xff]  ;;  %v599_v15 = vld [vmem:[%s2931_s5] sm:$0xff]  ;;  %s2087_s23 = sshll.u32 %s2953_s12, 3  ;;  %s2083_s12 = sshll.u32 %s2597_s14, 4 }
  0x3c   : > { %2190 = vmatpush3.msra.mxu0 %v387_v3  ;;  %2205 = vmatprep.subr.mxu1 %v602_v12  ;;  %v2116_v17 = vld [vmem:[%s369_s16 + $0x2] ss:$0 sm:$0xff]  ;;  %v2114_v18 = vld [vmem:[%s369_s16] ss:$0 sm:$0xff]  ;;  %v2117_v19 = vld [vmem:[%s369_s16 + $0x3] ss:$0 sm:$0xff]  ;;  %s2810_s25 = scalar_lea.vmem %s2934_s8, %s2087_s23 }
  0x3d   : > { %2191 = vmatprep.subr.mxu0 %v386_v4  ;;  %2206 = vmatpush3.msra.mxu1 %v602_v12  ;;  %v2115_v20 = vld [vmem:[%s369_s16 + $0x1] ss:$0 sm:$0xff]  ;;  %v2119_v21 = vld [vmem:[%s369_s16 + $0x5] ss:$0 sm:$0xff]  ;;  %v2118_v22 = vld [vmem:[%s369_s16 + $0x4] ss:$0 sm:$0xff] }
  0x3e   : > { %2192 = vmatpush3.msra.mxu0 %v386_v4  ;;  %2207 = vmatprep.subr.mxu1 %v601_v13  ;;  %v2121_v23 = vld [vmem:[%s369_s16 + $0x7] ss:$0 sm:$0xff]  ;;  %v2120_v24 = vld [vmem:[%s369_s16 + $0x6] ss:$0 sm:$0xff]  ;;  %v2088_v25 = vld [vmem:[%s2930_s4] ss:$0 sm:$0xff] }
  0x3f   : > { %2194 = vmatmul.mubr.msk.f32.vlgmr.msra.gmra.mxu0 %vm397_vm0, %v2621_v5  ;;  %2208 = vmatpush3.msra.mxu1 %v601_v13  ;;  %v2097_v32 = vld [vmem:[%s2675_s15] ss:$0 sm:$0xff]  ;;  %v2098_v33 = vld [vmem:[%s2675_s15 + $0x1] ss:$0 sm:$0xff]  ;;  %v2100_v38 = vld [vmem:[%s2675_s15 + $0x3] ss:$0 sm:$0xff] }
  0x40   : > { %2196 = vmatprep.mubr.msk.f32.mxu0 %vm397_vm0, %v2623_v6  ;;  %2209 = vmatprep.subr.mxu1 %v600_v14  ;;  %v2099_v42 = vld [vmem:[%s2675_s15 + $0x2] ss:$0 sm:$0xff]  ;;  %v2102_v50 = vld [vmem:[%s2675_s15 + $0x5] ss:$0 sm:$0xff]  ;;  %v2101_v52 = vld [vmem:[%s2675_s15 + $0x4] ss:$0 sm:$0xff] }
  0x41   : > { %2210 = vmatpush3.msra.mxu1 %v600_v14  ;;  %925 = vperm.xlu1 %2319, %v2116_v17   ;;  %v2104_v60 = vld [vmem:[%s2675_s15 + $0x7] ss:$0 sm:$0xff]  ;;  %v2103_v62 = vld [vmem:[%s2675_s15 + $0x6] ss:$0 sm:$0xff]  ;;  %v2450_v3 = vmov 0.0   ;;  %s352_s16 = scalar_lea.vmem [#allocation5], %s2083_s12  ;;  %s2882_s15 = scalar_lea.hbm %s2933_s7, %s2144_s13 }
  0x42   : > { %2211 = vmatprep.subr.mxu1 %v599_v15  ;;  %919 = vperm.xlu0 %2318, %v2114_v18   ;;  %v2105_v4 = vld [vmem:[%s2932_s6] ss:$0 sm:$0xff]  ;;  %s1955_s20 = sshll.u32 %s352_s16, 4  ;;  %s2452_s26 = smov [#allocation5]   ;;  %s2876_s20 = int_to_ptr.vmem [resolvable:$true] %s1955_s20 }
  0x43   : > { %2197 = vmatmul.mubr.msk.f32.gmra.mxu0 %vm397_vm0, %v2629_v7  ;;  %2212 = vmatpush3.msra.mxu1 %v599_v15  ;;  %s2380_s24 = scalar_lea.vmem %s2876_s20, 256  ;;  %s2384_s23 = sshll.u32 %s2452_s26, 4  ;;  %s2385_s23 = int_to_ptr.vmem [resolvable:$false] %s2384_s23 }
  0x44   : > { %2199 = vmatprep.mubr.msk.f32.mxu0 %vm397_vm0, %v2631_v8  ;;  %2225 = vmatprep.subr.mxu0 %v2450_v3  ;;  %p2381_p12 = scmp.ne.s32.totalorder %s2876_s20, %s2380_s24  ;;  %s2386_s10 = scalar_lea.vmem %s2385_s23, 512 }
  0x45   : > { %928 = vperm.xlu1 %2319, %v2117_v19   ;;  %2230 = vmatprep.subr.mxu1 %v2450_v3  ;;  %p2387_p7 = scmp.lt.s32.totalorder %s2876_s20, %s2385_s23  ;;  %p2388_p8 = scmp.lt.s32.totalorder %s2386_s10, %s2380_s24 }
  0x46   : > { %922 = vperm.xlu0 %2318, %v2115_v20   ;;  %2226 = vmatpush3.msra.mxu0 %v2611_v2  ;;  %p2382_p4 = pnand %p2381_p12, %p2944_p13 }
  0x47   : > { %2200 = vmatmul.mubr.msk.f32.gmra.mxu0 %vm397_vm0, %v2637_v9  ;;  %2235 = vmatprep.subr.mxu0 %v2450_v3  ;;  %p2389_p10 = por %p2388_p8, %p2387_p7 }
  0x48   : > { %2202 = vmatprep.mubr.msk.f32.mxu0 %vm397_vm0, %v2639_v10  ;;  %p2383_p5 = pneg %p2382_p4 }
  0x49   : > { %934 = vperm.xlu1 %2319, %v2119_v21  }
  0x4a   : > { %931 = vperm.xlu0 %2318, %v2118_v22   ;;  %p2390_p0 = pnand %p2389_p10, %p2383_p5 }
  0x4b   : > { %2203 = vmatmul.mubr.msk.f32.gmra.mxu0 %vm397_vm0, %v2645_v11 }
  0x4c   : > { %2227 = vmatprep.mubr.msk.f32.mxu0 %vm2451_vm1, %v2450_v3 }
  0x4d   : > { %940 = vperm.xlu1 %2319, %v2121_v23  }
  0x4e   : > { %937 = vperm.xlu0 %2318, %v2120_v24  }
  0xff   : > { %v2195_v26 = vpop.f32.mrf.mxu0 }
 0x100   : > { %v494_v27 = vadd.f32 %v2195_v26, %v2088_v25 }
 0x101   : > { %v488_v28 = vpop.f32.mrf.mxu0 }
 0x102   : > { %v489_v29 = vadd.f32 %v2088_v25, %v488_v28  ;;  %v528_v30 = vmax.f32 %v494_v27, 0.0 }
 0x103   : > { %v2198_v31 = vpop.f32.mrf.mxu0 }
 0x104   : > { %v527_v34 = vmax.f32 %v489_v29, 0.0  ;;  %v504_v35 = vadd.f32 %v2198_v31, %v2088_v25  ;;  %v592_v41 = vmul.f32 %v2098_v33, %v528_v30 }
 0x105   : > { %v498_v36 = vpop.f32.mrf.mxu0 }
 0x106   : > { %v530_v37 = vmax.f32 %v504_v35, 0.0  ;;  %v499_v39 = vadd.f32 %v2088_v25, %v498_v36  ;;  %v591_v40 = vmul.f32 %v2097_v32, %v527_v34 }
 0x107   : > { %v2201_v43 = vpop.f32.mrf.mxu0 }
 0x108   : > { %v529_v44 = vmax.f32 %v499_v39, 0.0  ;;  %v514_v45 = vadd.f32 %v2201_v43, %v2088_v25  ;;  %2213 = vmatprep.mubr.msk.f32.mxu1 %vm397_vm0, %v591_v40  ;;  %v594_v46 = vmul.f32 %v2100_v38, %v530_v37 }
 0x109   : > { %v508_v47 = vpop.f32.mrf.mxu0  ;;  %2214 = vmatmul.mubr.msk.f32.vlgmr.msra.gmra.mxu1 %vm397_vm0, %v592_v41 }
 0x10a   : > { %v593_v48 = vmul.f32 %v2099_v42, %v529_v44  ;;  %v532_v49 = vmax.f32 %v514_v45, 0.0  ;;  %v509_v51 = vadd.f32 %v2088_v25, %v508_v47  ;;  %2231 = vmatpush3.msra.mxu1 %v2621_v5 }
 0x10b   : > { %v2204_v53 = vpop.f32.mrf.mxu0  ;;  %2240 = vmatprep.subr.mxu1 %v2450_v3 }
 0x10c   : > { %v531_v54 = vmax.f32 %v509_v51, 0.0  ;;  %v524_v55 = vadd.f32 %v2204_v53, %v2088_v25  ;;  %2216 = vmatprep.mubr.msk.f32.mxu1 %vm397_vm0, %v593_v48  ;;  %v596_v56 = vmul.f32 %v2102_v50, %v532_v49 }
 0x10d   : > { %v518_v57 = vpop.f32.mrf.mxu0  ;;  %2217 = vmatmul.mubr.msk.f32.gmra.mxu1 %vm397_vm0, %v594_v46 }
 0x10e   : > { %v595_v58 = vmul.f32 %v2101_v52, %v531_v54  ;;  %v534_v59 = vmax.f32 %v524_v55, 0.0  ;;  %v519_v61 = vadd.f32 %v2088_v25, %v518_v57 }
 0x110   : > { %v533_v63 = vmax.f32 %v519_v61, 0.0  ;;  %2219 = vmatprep.mubr.msk.f32.mxu1 %vm397_vm0, %v595_v58  ;;  %v598_v0 = vmul.f32 %v2104_v60, %v534_v59 }
 0x111   : > { %2220 = vmatmul.mubr.msk.f32.gmra.mxu1 %vm397_vm0, %v596_v56 }
 0x112   : > { %v597_v1 = vmul.f32 %v2103_v62, %v533_v63 }
 0x114   : > { %2222 = vmatprep.mubr.msk.f32.mxu1 %vm397_vm0, %v597_v1 }
 0x115   : > { %2223 = vmatmul.mubr.msk.f32.gmra.mxu1 %vm397_vm0, %v598_v0 }
 0x116   : > { %2232 = vmatprep.mubr.msk.f32.mxu1 %vm2451_vm1, %v2450_v3 }
 0x1c9   : > { %v2215_v12 = vpop.f32.mrf.mxu1 }
 0x1ca   : > { %v706_v2 = vadd.f32 %v2215_v12, %v2105_v4 }
 0x1cb   : > { %v700_v13 = vpop.f32.mrf.mxu1 }
 0x1cc   : > { %v747_v5 = vsel %vm739_vm2, %v706_v2, -inf  ;;  %v701_v14 = vadd.f32 %v2105_v4, %v700_v13 }
 0x1cd   : > { %v748_v15 = vrot.slane %v747_v5, 4  ;;  %v2218_v16 = vpop.f32.mrf.mxu1 }
 0x1ce   : > { %v740_v17 = vsel %vm739_vm2, %v701_v14, -inf  ;;  %v716_v18 = vadd.f32 %v2218_v16, %v2105_v4 }
 0x1cf   : > { %v749_v19 = vmax.f32 %v747_v5, %v748_v15  ;;  %v741_v20 = vrot.slane %v740_v17, 4  ;;  %v710_v21 = vpop.f32.mrf.mxu1 }
 0x1d0   : > { %v761_v22 = vsel %vm739_vm2, %v716_v18, -inf  ;;  %v2709_v23 = vadd.f32 %v2105_v4, %v710_v21 }
 0x1d1   : > { %v750_v24 = vrot.slane %v749_v19, 2  ;;  %v742_v25 = vmax.f32 %v740_v17, %v741_v20  ;;  %v762_v26 = vrot.slane %v761_v22, 4  ;;  %v2221_v27 = vpop.f32.mrf.mxu1 }
 0x1d2   : > { %v754_v28 = vsel %vm739_vm2, %v2709_v23, -inf  ;;  %v2713_v29 = vadd.f32 %v2221_v27, %v2105_v4 }
 0x1d3   : > { %v751_v30 = vmax.f32 %v749_v19, %v750_v24  ;;  %v743_v31 = vrot.slane %v742_v25, 2  ;;  %v763_v32 = vmax.f32 %v761_v22, %v762_v26  ;;  %v755_v33 = vrot.slane %v754_v28, 4  ;;  %v720_v34 = vpop.f32.mrf.mxu1 }
 0x1d4   : > { %v775_v35 = vsel %vm739_vm2, %v2713_v29, -inf  ;;  %v2717_v36 = vadd.f32 %v2105_v4, %v720_v34  ;;  %v920_v34 = vpop.permute.xlu0 %919 }
 0x1d5   : > { %v752_v37 = vrot.slane %v751_v30, 1  ;;  %v744_v38 = vmax.f32 %v742_v25, %v743_v31  ;;  %v764_v39 = vrot.slane %v763_v32, 2  ;;  %v756_v40 = vmax.f32 %v754_v28, %v755_v33  ;;  %v2224_v41 = vpop.f32.mrf.mxu1 }
 0x1d6   : > { %v776_v42 = vrot.slane %v775_v35, 4  ;;  %v768_v43 = vsel %vm739_vm2, %v2717_v36, -inf  ;;  %v736_v44 = vadd.f32 %v2224_v41, %v2105_v4 }
 0x1d7   : > { %v753_v45 = vmax.f32 %v751_v30, %v752_v37  ;;  %v745_v46 = vrot.slane %v744_v38, 1  ;;  %v765_v47 = vmax.f32 %v763_v32, %v764_v39  ;;  %v757_v48 = vrot.slane %v756_v40, 2  ;;  %v730_v49 = vpop.f32.mrf.mxu1 }
 0x1d8   : > { %v777_v50 = vmax.f32 %v775_v35, %v776_v42  ;;  %v769_v51 = vrot.slane %v768_v43, 4  ;;  %v789_v52 = vsel %vm739_vm2, %v736_v44, -inf  ;;  %v731_v53 = vadd.f32 %v2105_v4, %v730_v49 }
 0x1d9   : > { %v797_v54 = vsub.f32 %v706_v2, %v753_v45  ;;  %v746_v55 = vmax.f32 %v744_v38, %v745_v46  ;;  %v766_v56 = vrot.slane %v765_v47, 1  ;;  %v758_v57 = vmax.f32 %v756_v40, %v757_v48  ;;  %v923_v46 = vpop.permute.xlu0 %922 }
 0x1da   : > { %v778_v58 = vrot.slane %v777_v50, 2  ;;  %v770_v59 = vmax.f32 %v768_v43, %v769_v51  ;;  %v790_v60 = vrot.slane %v789_v52, 4  ;;  %v782_v61 = vsel %vm739_vm2, %v731_v53, -inf  ;;  %v926_v43 = vpop.permute.xlu1 %925 }
 0x1db   : > { %v806_v62 = vmul.f32 1.442695, %v797_v54  ;;  %v796_v63 = vsub.f32 %v701_v14, %v746_v55  ;;  %v767_v0 = vmax.f32 %v765_v47, %v766_v56  ;;  %v759_v1 = vrot.slane %v758_v57, 1 }
 0x1dc   : > { %v779_v12 = vmax.f32 %v777_v50, %v778_v58  ;;  %v771_v13 = vrot.slane %v770_v59, 2  ;;  %v791_v5 = vmax.f32 %v789_v52, %v790_v60  ;;  %v783_v15 = vrot.slane %v782_v61, 4 }
 0x1dd   : > { %2320 = vpow2.f32 %v806_v62  ;;  %v804_v16 = vmul.f32 1.442695, %v796_v63  ;;  %v799_v4 = vsub.f32 %v716_v18, %v767_v0  ;;  %v760_v2 = vmax.f32 %v758_v57, %v759_v1 }
 0x1de   : > { %v780_v17 = vrot.slane %v779_v12, 1  ;;  %v772_v19 = vmax.f32 %v770_v59, %v771_v13  ;;  %v792_v20 = vrot.slane %v791_v5, 2  ;;  %v784_v21 = vmax.f32 %v782_v61, %v783_v15 }
 0x1df   : > { %2322 = vpow2.f32 %v804_v16  ;;  %v810_v22 = vmul.f32 1.442695, %v799_v4  ;;  %v798_v24 = vsub.f32 %v2709_v23, %v760_v2  ;;  %v876_v30 = vlaneseq }
 0x1e0   : > { %v781_v25 = vmax.f32 %v779_v12, %v780_v17  ;;  %v773_v14 = vrot.slane %v772_v19, 1  ;;  %v793_v26 = vmax.f32 %v791_v5, %v792_v20  ;;  %v785_v27 = vrot.slane %v784_v21, 2 }
 0x1e1   : > { %2324 = vpow2.f32 %v810_v22  ;;  %v808_v28 = vmul.f32 1.442695, %v798_v24  ;;  %v2726_v23 = vshrl.u32 %v876_v30, 7 }
 0x1e2   : > { %v801_v31 = vsub.f32 %v2713_v29, %v781_v25  ;;  %v774_v32 = vmax.f32 %v772_v19, %v773_v14  ;;  %v794_v18 = vrot.slane %v793_v26, 1  ;;  %v786_v33 = vmax.f32 %v784_v21, %v785_v27 }
 0x1e3   : > { %2326 = vpow2.f32 %v808_v28  ;;  %vm943_vm3 = vcmp.ge.s32.totalorder %v2726_v23, %v923_v46  ;;  %vm942_vm4 = vcmp.ge.s32.totalorder %v2726_v23, %v920_v34  ;;  %vm944_vm5 = vcmp.ge.s32.totalorder %v2726_v23, %v926_v43  ;;  %v932_v43 = vpop.permute.xlu0 %931 }
 0x1e4   : > { %v814_v35 = vmul.f32 1.442695, %v801_v31  ;;  %v800_v37 = vsub.f32 %v2717_v36, %v774_v32  ;;  %v795_v38 = vmax.f32 %v793_v26, %v794_v18  ;;  %v787_v39 = vrot.slane %v786_v33, 1 }
 0x1e5   : > { %vm946_vm8 = vcmp.ge.s32.totalorder %v2726_v23, %v932_v43 }
 0x1e6   : > { %2328 = vpow2.f32 %v814_v35  ;;  %v812_v40 = vmul.f32 1.442695, %v800_v37  ;;  %v803_v41 = vsub.f32 %v736_v44, %v795_v38  ;;  %v788_v42 = vmax.f32 %v786_v33, %v787_v39 }
 0x1e8   : > { %2330 = vpow2.f32 %v812_v40  ;;  %v818_v45 = vmul.f32 1.442695, %v803_v41  ;;  %v802_v29 = vsub.f32 %v731_v53, %v788_v42  ;;  %v929_v53 = vpop.permute.xlu1 %928 }
 0x1e9   : > { %vm945_vm6 = vcmp.ge.s32.totalorder %v2726_v23, %v929_v53 }
 0x1ea   : > { %v2321_v47 = vpop.eup %2320  ;;  %2332 = vpow2.f32 %v818_v45  ;;  %v816_v48 = vmul.f32 1.442695, %v802_v29 }
 0x1eb   : > { %v827_v36 = vsel %vm739_vm2, %v2321_v47, 0.0  ;;  %v2731_v51 = vsel %vm943_vm3, 0.0, %v2321_v47 }
 0x1ec   : > { %v2323_v49 = vpop.eup %2322  ;;  %v828_v50 = vrot.slane %v827_v36, 4  ;;  %2334 = vpow2.f32 %v816_v48  ;;  %v965_v60 = vsel %vm739_vm2, %v2731_v51, 0.0  ;;  %v935_v18 = vpop.permute.xlu1 %934 }
 0x1ed   : > { %v820_v44 = vsel %vm739_vm2, %v2323_v49, 0.0  ;;  %v2734_v52 = vsel %vm942_vm4, 0.0, %v2323_v49  ;;  %v966_v26 = vrot.slane %v965_v60, 4  ;;  %vm947_vm7 = vcmp.ge.s32.totalorder %v2726_v23, %v935_v18 }
 0x1ee   : > { %v2325_v54 = vpop.eup %2324  ;;  %v821_v55 = vrot.slane %v820_v44, 4  ;;  %v958_v56 = vsel %vm739_vm2, %v2734_v52, 0.0  ;;  %v829_v1 = vadd.f32 %v828_v50, %v827_v36 }
 0x1ef   : > { %v841_v57 = vsel %vm739_vm2, %v2325_v54, 0.0  ;;  %v959_v58 = vrot.slane %v958_v56, 4  ;;  %v2741_v59 = vsel %vm945_vm6, 0.0, %v2325_v54  ;;  %v967_v29 = vadd.f32 %v966_v26, %v965_v60 }
 0x1f0   : > { %v2327_v61 = vpop.eup %2326  ;;  %v842_v62 = vrot.slane %v841_v57, 4  ;;  %v822_v63 = vadd.f32 %v821_v55, %v820_v44  ;;  %v979_v0 = vsel %vm739_vm2, %v2741_v59, 0.0  ;;  %v830_v32 = vrot.slane %v829_v1, 2 }
 0x1f1   : > { %v834_v12 = vsel %vm739_vm2, %v2327_v61, 0.0  ;;  %v2748_v13 = vsel %vm944_vm5, 0.0, %v2327_v61  ;;  %v960_v5 = vadd.f32 %v959_v58, %v958_v56  ;;  %v980_v15 = vrot.slane %v979_v0, 4  ;;  %v941_v58 = vpop.permute.xlu1 %940 }
 0x1f2   : > { %v835_v16 = vrot.slane %v834_v12, 4  ;;  %v972_v4 = vsel %vm739_vm2, %v2748_v13, 0.0  ;;  %v823_v2 = vrot.slane %v822_v63, 2  ;;  %v843_v17 = vadd.f32 %v842_v62, %v841_v57 }
 0x1f3   : > { %v2329_v19 = vpop.eup %2328  ;;  %v973_v20 = vrot.slane %v972_v4, 4  ;;  %v961_v21 = vrot.slane %v960_v5, 2  ;;  %v981_v22 = vadd.f32 %v980_v15, %v979_v0  ;;  %v831_v54 = vadd.f32 %v830_v32, %v829_v1  ;;  %v938_v15 = vpop.permute.xlu0 %937 }
 0x1f4   : > { %v836_v24 = vadd.f32 %v835_v16, %v834_v12  ;;  %v824_v25 = vadd.f32 %v823_v2, %v822_v63  ;;  %v844_v14 = vrot.slane %v843_v17, 2  ;;  %v855_v33 = vsel %vm739_vm2, %v2329_v19, 0.0 }
 0x1f5   : > { %v2752_v27 = vpop.eup %2330  ;;  %v974_v28 = vadd.f32 %v973_v20, %v972_v4  ;;  %v962_v30 = vadd.f32 %v961_v21, %v960_v5  ;;  %v982_v31 = vrot.slane %v981_v22, 2  ;;  %v856_v50 = vrot.slane %v855_v33, 4 }
 0x1f6   : > { %v848_v34 = vsel %vm739_vm2, %v2752_v27, 0.0  ;;  %v837_v35 = vrot.slane %v836_v24, 2  ;;  %v845_v37 = vadd.f32 %v844_v14, %v843_v17  ;;  %v825_v40 = vrot.slane %v824_v25, 1 }
 0x1f7   : > { %v2757_v38 = vpop.eup %2332  ;;  %v975_v39 = vrot.slane %v974_v28, 2  ;;  %v963_v41 = vrot.slane %v962_v30, 1  ;;  %v983_v42 = vadd.f32 %v982_v31, %v981_v22  ;;  %v849_v44 = vrot.slane %v848_v34, 4 }
 0x1f8   : > { %v2761_v45 = vsel %vm739_vm2, %v2757_v38, 0.0  ;;  %v838_v47 = vadd.f32 %v837_v35, %v836_v24  ;;  %v846_v53 = vrot.slane %v845_v37, 1  ;;  %v826_v56 = vadd.f32 %v825_v40, %v824_v25 }
 0x1f9   : > { %v2764_v46 = vpop.eup %2334  ;;  %v976_v48 = vadd.f32 %v975_v39, %v974_v28  ;;  %v964_v36 = vadd.f32 %v963_v41, %v962_v30  ;;  %v984_v49 = vrot.slane %v983_v42, 1  ;;  %v870_v60 = vrot.slane %v2761_v45, 4 }
 0x1fa   : > { %v862_v61 = vsel %vm739_vm2, %v2764_v46, 0.0  ;;  %v968_v63 = vrot.slane %v967_v29, 2  ;;  %v839_v0 = vrot.slane %v838_v47, 1  ;;  %v847_v16 = vadd.f32 %v846_v53, %v845_v37 }
 0x1fb   : > { %v977_v55 = vrot.slane %v976_v48, 1  ;;  %vm1014_vm9 = vcmp.eq.f32.partialorder %v964_v36, 0.0  ;;  %v985_v57 = vadd.f32 %v984_v49, %v983_v42  ;;  %v2774_v2 = vsel %vm947_vm7, 0.0, %v2329_v19 }
 0x1fc   : > { %v2122_v62 = vsel %vm1014_vm9, 1.0, %v2450_v3  ;;  %v969_v4 = vadd.f32 %v968_v63, %v967_v29  ;;  %vm949_vm11 = vcmp.ge.s32.totalorder %v2726_v23, %v941_v58  ;;  %v857_v21 = vadd.f32 %v856_v50, %v855_v33 }
 0x1fd   : > { %v978_v12 = vadd.f32 %v977_v55, %v976_v48  ;;  %v1038_v5 = vadd.f32 1e-08, %v2122_v62  ;;  %vm1017_vm10 = vcmp.eq.f32.partialorder %v985_v57, 0.0  ;;  %v832_v24 = vrot.slane %v831_v54, 1 }
 0x1fe   : > { %v2125_v1 = vsel %vm1017_vm10, 1.0, %v2450_v3  ;;  %v970_v25 = vrot.slane %v969_v4, 1  ;;  %v993_v14 = vsel %vm739_vm2, %v2774_v2, 0.0  ;;  %vm948_vm13 = vcmp.ge.s32.totalorder %v2726_v23, %v938_v15 }
 0x1ff   : > { %vm1016_vm12 = vcmp.eq.f32.partialorder %v978_v12, 0.0  ;;  %v1046_v17 = vmul.f32 %v1038_v5, %v826_v56  ;;  %v1041_v20 = vadd.f32 1e-08, %v2125_v1  ;;  %v840_v26 = vadd.f32 %v839_v0, %v838_v47 }
 0x200   : > { %v2124_v22 = vsel %vm1016_vm12, 1.0, %v2450_v3  ;;  %v971_v31 = vadd.f32 %v970_v25, %v969_v4  ;;  %v994_v32 = vrot.slane %v993_v14, 4  ;;  %v850_v18 = vadd.f32 %v849_v44, %v848_v34 }
 0x201   : > { %v1040_v28 = vadd.f32 1e-08, %v2124_v22  ;;  %v1054_v30 = vadd.f32 %v1046_v17, %v964_v36  ;;  %v1049_v19 = vmul.f32 %v1041_v20, %v847_v16  ;;  %v2784_v33 = vsel %vm946_vm8, 0.0, %v2752_v27 }
 0x202   : > { %v858_v39 = vrot.slane %v857_v21, 2  ;;  %v863_v40 = vrot.slane %v862_v61, 4  ;;  %vm1015_vm14 = vcmp.eq.f32.partialorder %v971_v31, 0.0  ;;  %v995_v41 = vadd.f32 %v994_v32, %v993_v14 }
 0x203   : > { %v1048_v35 = vmul.f32 %v1040_v28, %v840_v26  ;;  %2336 = vrcp.f32 %v1054_v30  ;;  %v1057_v37 = vadd.f32 %v1049_v19, %v985_v57  ;;  %v986_v42 = vsel %vm739_vm2, %v2784_v33, 0.0 }
 0x204   : > { %v833_v47 = vadd.f32 %v832_v24, %v831_v54  ;;  %v2123_v34 = vsel %vm1015_vm14, 1.0, %v2450_v3  ;;  %v996_v36 = vrot.slane %v995_v41, 2  ;;  %v851_v43 = vrot.slane %v850_v18, 2 }
 0x205   : > { %v1056_v29 = vadd.f32 %v1048_v35, %v978_v12  ;;  %2338 = vrcp.f32 %v1057_v37  ;;  %v1039_v48 = vadd.f32 1e-08, %v2123_v34  ;;  %v987_v27 = vrot.slane %v986_v42, 4 }
 0x206   : > { %v859_v49 = vadd.f32 %v858_v39, %v857_v21  ;;  %v871_v50 = vadd.f32 %v870_v60, %v2761_v45  ;;  %v2793_v44 = vsel %vm949_vm11, 0.0, %v2757_v38  ;;  %v997_v55 = vadd.f32 %v996_v36, %v995_v41 }
 0x207   : > { %2340 = vrcp.f32 %v1056_v29  ;;  %v1047_v53 = vmul.f32 %v1039_v48, %v833_v47  ;;  %v988_v56 = vadd.f32 %v987_v27, %v986_v42  ;;  %v1007_v54 = vsel %vm739_vm2, %v2793_v44, 0.0 }
 0x208   : > { %v1008_v57 = vrot.slane %v1007_v54, 4  ;;  %v864_v62 = vadd.f32 %v863_v40, %v862_v61  ;;  %v2800_v63 = vsel %vm948_vm13, 0.0, %v2764_v46  ;;  %v998_v45 = vrot.slane %v997_v55, 1 }
 0x209   : > { %v1055_v0 = vadd.f32 %v1047_v53, %v971_v31  ;;  %v989_v60 = vrot.slane %v988_v56, 2  ;;  %v1000_v38 = vsel %vm739_vm2, %v2800_v63, 0.0  ;;  %v852_v58 = vadd.f32 %v851_v43, %v850_v18 }
 0x20a   : > { %v872_v12 = vrot.slane %v871_v50, 2  ;;  %v1009_v5 = vadd.f32 %v1008_v57, %v1007_v54  ;;  %v1001_v16 = vrot.slane %v1000_v38, 4  ;;  %v860_v1 = vrot.slane %v859_v49, 1 }
 0x20b   : > { %2342 = vrcp.f32 %v1055_v0  ;;  %v999_v4 = vadd.f32 %v998_v45, %v997_v55  ;;  %v990_v61 = vadd.f32 %v989_v60, %v988_v56  ;;  %v865_v20 = vrot.slane %v864_v62, 2 }
 0x20c   : > { %v1010_v17 = vrot.slane %v1009_v5, 2  ;;  %v1002_v23 = vadd.f32 %v1001_v16, %v1000_v38  ;;  %v853_v21 = vrot.slane %v852_v58, 1  ;;  %v873_v22 = vadd.f32 %v872_v12, %v871_v50 }
 0x20d   : > { %vm1019_vm15 = vcmp.eq.f32.partialorder %v999_v4, 0.0  ;;  %v991_v46 = vrot.slane %v990_v61, 1  ;;  %v861_v14 = vadd.f32 %v860_v1, %v859_v49  ;;  %v866_v32 = vadd.f32 %v865_v20, %v864_v62 }
 0x20e   : > { %v2127_v15 = vsel %vm1019_vm15, 1.0, %v2450_v3  ;;  %v1011_v24 = vadd.f32 %v1010_v17, %v1009_v5  ;;  %v1003_v30 = vrot.slane %v1002_v23, 2  ;;  %v854_v47 = vadd.f32 %v853_v21, %v852_v58 }
 0x20f   : > { %v1043_v26 = vadd.f32 1e-08, %v2127_v15  ;;  %v992_v28 = vadd.f32 %v991_v46, %v990_v61  ;;  %v867_v43 = vrot.slane %v866_v32, 1  ;;  %vm1110_vm5 = vcmask 64512  }
 0x210   : > { %v2337_v25 = vpop.eup %2336  ;;  %v1012_v31 = vrot.slane %v1011_v24, 1  ;;  %v1004_v37 = vadd.f32 %v1003_v30, %v1002_v23 }
 0x211   : > { %v1070_v19 = vmul.f32 %v2337_v25, %v2734_v52  ;;  %v1051_v35 = vmul.f32 %v1043_v26, %v861_v14  ;;  %vm1018_vm0 = vcmp.eq.f32.partialorder %v992_v28, 0.0  ;;  %v874_v52 = vrot.slane %v873_v22, 1 }
 0x212   : > { %v2339_v18 = vpop.eup %2338  ;;  %v2126_v40 = vsel %vm1018_vm0, 1.0, %v2450_v3  ;;  %v1013_v41 = vadd.f32 %v1012_v31, %v1011_v24  ;;  %v1005_v48 = vrot.slane %v1004_v37, 1  ;;  %v868_v62 = vadd.f32 %v867_v43, %v866_v32 }
 0x213   : > { %1928 = vst.msk [vmem:[%s2810_s25] sm:$0xff] %vm739_vm2, %v1070_v19  ;;  %v1073_v39 = vmul.f32 %v2339_v18, %v2741_v59  ;;  %1078 = vxpose.xlu0.b32.start.end [1/1] (short) (narrow) %v1070_v19, 8  ;;  %v1059_v29 = vadd.f32 %v1051_v35, %v999_v4  ;;  %v1042_v34 = vadd.f32 1e-08, %v2126_v40  ;;  %v875_v50 = vadd.f32 %v874_v52, %v873_v22 }
 0x214   : > { %v2341_v42 = vpop.eup %2340  ;;  %vm1021_vm3 = vcmp.eq.f32.partialorder %v1013_v41, 0.0  ;;  %v1006_v49 = vadd.f32 %v1005_v48, %v1004_v37 }
 0x215   : > { %v1072_v36 = vmul.f32 %v2341_v42, %v2748_v13  ;;  %1931 = vst.msk [vmem:[%s2810_s25 + $0x18] sm:$0xff] %vm739_vm2, %v1073_v39  ;;  %2344 = vrcp.f32 %v1059_v29  ;;  %v1050_v27 = vmul.f32 %v1042_v34, %v854_v47  ;;  %v2129_v59 = vsel %vm1021_vm3, 1.0, %v2450_v3 }
 0x216   : > { %v1045_v53 = vadd.f32 1e-08, %v2129_v59  ;;  %vm1020_vm4 = vcmp.eq.f32.partialorder %v1006_v49, 0.0 }
 0x217   : > { %1930 = vst.msk [vmem:[%s2810_s25 + $0x10] sm:$0xff] %vm739_vm2, %v1072_v36  ;;  %1394 = vxpose.xlu0.b32.start.end [1/1] (short) (narrow) %v1073_v39, 8  ;;  %v1058_v55 = vadd.f32 %v1050_v27, %v992_v28  ;;  %v2128_v13 = vsel %vm1020_vm4, 1.0, %v2450_v3 }
 0x218   : > { %v2343_v56 = vpop.eup %2342  ;;  %v1053_v54 = vmul.f32 %v1045_v53, %v875_v50  ;;  %v1044_v0 = vadd.f32 1e-08, %v2128_v13 }
 0x219   : > { %v1071_v57 = vmul.f32 %v2343_v56, %v2731_v51  ;;  %2346 = vrcp.f32 %v1058_v55 }
 0x21a   : > { %v1061_v45 = vadd.f32 %v1053_v54, %v1013_v41  ;;  %v1052_v60 = vmul.f32 %v1044_v0, %v868_v62 }
 0x21b   : > { %1289 = vxpose.xlu0.b32.start.end [1/1] (short) (narrow) %v1072_v36, 8  ;;  %1929 = vst.msk [vmem:[%s2810_s25 + $0x8] sm:$0xff] %vm739_vm2, %v1071_v57  ;;  %1184 = vxpose.xlu1.b32.start.end [1/1] (short) (narrow) %v1071_v57, 8 }
 0x21c   : > { %2348 = vrcp.f32 %v1061_v45  ;;  %v1060_v38 = vadd.f32 %v1052_v60, %v1006_v49 }
 0x21e   : > { %2350 = vrcp.f32 %v1060_v38 }
 0x222   : > { %v2345_v58 = vpop.eup %2344 }
 0x223   : > { %v1075_v12 = vmul.f32 %v2345_v58, %v2774_v2 }
 0x225   : > { %1933 = vst.msk [vmem:[%s2810_s25 + $0x28] sm:$0xff] %vm739_vm2, %v1075_v12  ;;  %1604 = vxpose.xlu1.b32.start.end [1/1] (short) (narrow) %v1075_v12, 8 }
 0x226   : > { %v2347_v51 = vpop.eup %2346 }
 0x227   : > { %v1074_v5 = vmul.f32 %v2347_v51, %v2784_v33 }
 0x229   : > { %v2349_v16 = vpop.eup %2348  ;;  %1932 = vst.msk [vmem:[%s2810_s25 + $0x20] sm:$0xff] %vm739_vm2, %v1074_v5  ;;  %1499 = vxpose.xlu0.b32.start.end [1/1] (short) (narrow) %v1074_v5, 8 }
 0x22a   : > { %v1077_v1 = vmul.f32 %v2349_v16, %v2793_v44 }
 0x22b   : > { %v2351_v4 = vpop.eup %2350 }
 0x22c   : > { %1935 = vst.msk [vmem:[%s2810_s25 + $0x38] sm:$0xff] %vm739_vm2, %v1077_v1  ;;  %1814 = vxpose.xlu1.b32.start.end [1/1] (short) (narrow) %v1077_v1, 8  ;;  %v1076_v61 = vmul.f32 %v2351_v4, %v2800_v63 }
 0x22e   : > { %1934 = vst.msk [vmem:[%s2810_s25 + $0x30] sm:$0xff] %vm739_vm2, %v1076_v61  ;;  %1709 = vxpose.xlu0.b32.start.end [1/1] (short) (narrow) %v1076_v61, 8  ;;  %vm1919_vm2 = vcmask 254976  }
 0x28f   : > { %v1094_v2 = vpop.trf.xlu0 }
 0x290   : > { %2228 = vmatmul.mubr.msk.f32.vlgmr.msra.gmra.mxu0 %vm1110_vm5, %v1094_v2 }
 0x291   : > { %2236 = vmatpush3.msra.mxu0 %v2623_v6  ;;  %2237 = vmatprep.mubr.msk.f32.mxu0 %vm2451_vm1, %v2450_v3 }
 0x292   : > { %2245 = vmatprep.subr.mxu0 %v2450_v3 }
 0x293   : > { %v1410_v33 = vpop.trf.xlu0 }
 0x297   : > { %v1305_v44 = vpop.trf.xlu0  ;;  %v1200_v17 = vpop.trf.xlu1 }
 0x298   : > { %2238 = vmatmul.mubr.msk.f32.vlgmr.msra.gmra.mxu0 %vm1110_vm5, %v1305_v44  ;;  %2233 = vmatmul.mubr.msk.f32.vlgmr.msra.gmra.mxu1 %vm1110_vm5, %v1200_v17 }
 0x299   : > { %2246 = vmatpush3.msra.mxu0 %v2631_v8  ;;  %2241 = vmatpush3.msra.mxu1 %v2629_v7 }
 0x29a   : > { %2242 = vmatprep.mubr.msk.f32.mxu1 %vm2451_vm1, %v2450_v3  ;;  %2250 = vmatprep.subr.mxu1 %v2450_v3 }
 0x29b   : > { %2247 = vmatprep.mubr.msk.f32.mxu0 %vm2451_vm1, %v2450_v3  ;;  %2255 = vmatprep.subr.mxu0 %v2450_v3 }
 0x29c   : > { %2243 = vmatmul.mubr.msk.f32.vlgmr.msra.gmra.mxu1 %vm1110_vm5, %v1410_v33 }
 0x29d   : > { %2251 = vmatpush3.msra.mxu1 %v2637_v9  ;;  %2252 = vmatprep.mubr.msk.f32.mxu1 %vm2451_vm1, %v2450_v3 }
 0x29e   : > { %2260 = vmatprep.subr.mxu1 %v2450_v3 }
 0x2a1   : > { %v1620_v6 = vpop.trf.xlu1 }
 0x2a2   : > { %2253 = vmatmul.mubr.msk.f32.vlgmr.msra.gmra.mxu1 %vm1110_vm5, %v1620_v6 }
 0x2a3   : > { %2261 = vmatpush3.msra.mxu1 %v2645_v11  ;;  %2262 = vmatprep.mubr.msk.f32.mxu1 %vm2451_vm1, %v2450_v3 }
 0x2a5   : > { %v1515_v7 = vpop.trf.xlu0 }
 0x2a6   : > { %2248 = vmatmul.mubr.msk.f32.vlgmr.msra.gmra.mxu0 %vm1110_vm5, %v1515_v7 }
 0x2a7   : > { %2256 = vmatpush3.msra.mxu0 %v2639_v10  ;;  %2257 = vmatprep.mubr.msk.f32.mxu0 %vm2451_vm1, %v2450_v3 }
 0x2a8   : > { %v1830_v8 = vpop.trf.xlu1 }
 0x2a9   : > { %2263 = vmatmul.mubr.msk.f32.vlgmr.msra.gmra.mxu1 %vm1110_vm5, %v1830_v8 }
 0x2aa   : > { %v1725_v9 = vpop.trf.xlu0 }
 0x2ab   : > { %2258 = vmatmul.mubr.msk.f32.vlgmr.msra.gmra.mxu0 %vm1110_vm5, %v1725_v9 }
 0x350   : > { %v1180_v11 = vpop.f32.mrf.mxu0 }
 0x351   : > { %1920 = vst.msk [vmem:[%s352_s16] sm:$0x3] %vm1919_vm2, %v1180_v11 }
 0x352   : > { %v2229_v63 = vpop.f32.mrf.mxu0 }
 0x358   : > { %v1390_v20 = vpop.f32.mrf.mxu0  ;;  %v1285_v23 = vpop.f32.mrf.mxu1 }
 0x359   : > { %1922 = vst.msk [vmem:[%s352_s16 + $0x4] sm:$0x3] %vm1919_vm2, %v1390_v20  ;;  %1921 = vst.msk [vmem:[%s352_s16 + $0x2] sm:$0x3] %vm1919_vm2, %v1285_v23 }
 0x35a   : > { %v2239_v10 = vpop.f32.mrf.mxu0  ;;  %v2234_v3 = vpop.f32.mrf.mxu1 }
 0x35c   : > { %v1495_v46 = vpop.f32.mrf.mxu1 }
 0x35d   : > { %1923 = vst.msk [vmem:[%s352_s16 + $0x6] sm:$0x3] %vm1919_vm2, %v1495_v46 }
 0x35e   : > { %v2244_v15 = vpop.f32.mrf.mxu1 }
 0x362   : > { %v1705_v21 = vpop.f32.mrf.mxu1 }
 0x363   : > { %1925 = vst.msk [vmem:[%s352_s16 + $0xa] sm:$0x3] %vm1919_vm2, %v1705_v21 }
 0x364   : > { %v2254_v22 = vpop.f32.mrf.mxu1 }
 0x366   : > { %v1600_v24 = vpop.f32.mrf.mxu0 }
 0x367   : > { %1924 = vst.msk [vmem:[%s352_s16 + $0x8] sm:$0x3] %vm1919_vm2, %v1600_v24 }
 0x368   : > { %v2249_v25 = vpop.f32.mrf.mxu0 }
 0x369   : > { %v1915_v14 = vpop.f32.mrf.mxu1 }
 0x36a   : > { %1927 = vst.msk [vmem:[%s352_s16 + $0xe] sm:$0x3] %vm1919_vm2, %v1915_v14 }
 0x36b   : > { %v2264_v26 = vpop.f32.mrf.mxu1  ;;  %v1810_v28 = vpop.f32.mrf.mxu0 }
 0x36c   : > { %1926 = vst.msk [vmem:[%s352_s16 + $0xc] sm:$0x3] %vm1919_vm2, %v1810_v28 }
 0x36d   : > { %v2259_v30 = vpop.f32.mrf.mxu0 }
 0x36e   : > { %2393 = shalt.err (!%p2390_p0)
}
 0x36f   : > { %s2394_s19 = scalar_lea.hbm %s2882_s15, 256  ;;  %s2398_s16 = scalar_lea.hbm %s2933_s7, 512 }
 0x370   : > { %p2395_p2 = scmp.ne.s32.totalorder %s2882_s15, %s2394_s19  ;;  %p2399_p3 = scmp.lt.s32.totalorder %s2882_s15, %s2933_s7 }
 0x371   : > { %p2400_p6 = scmp.lt.s32.totalorder %s2398_s16, %s2394_s19 }
 0x372   : > { %p2396_p9 = pnand %p2395_p2, %p2944_p13 }
 0x373   : > { %p2401_p11 = por %p2400_p6, %p2399_p3 }
 0x374   : > { %p2397_p1 = pneg %p2396_p9 }
 0x376   : > { %p2402_p12 = pnand %p2401_p11, %p2397_p1 }
 0x378   : > { %2405 = shalt.err (!%p2402_p12)
}
 0x379   : > { %s2453_s21 = smov 32   ;;  %s2454_s24 = smov 2  }
 0x37a   : > { %2267 = dma.vmem_to_hbm [thread:$0]  (%p2944_p13), %s2876_s20, 256, %s2882_s15, %s1937_s9, %s2453_s21, %s2453_s21, %s2454_s24  }
 0x37b PF: > { %s1974_s26 = sand.u32 1, %s2432_s27   ;;  %p2945_p4 = scmp.ne.s32.totalorder %s2941_s18, 0 }
 0x37c   : > { %p2946_p5 = scmp.ge.s32.totalorder %s2444_s30, 2  ;;  %s1975_s23 = scalar_lea.sflag [#allocation4], %s1974_s26 }
 0x37e   : > { %p2274_p7 = pnand %p2946_p5, %p2945_p4 }
 0x380   : > { %p2275_p8 = pneg %p2274_p7 }
 0x382   : > { %2427 = dma.done.wait (%p2275_p8), %s1975_s23, 256  }
 0x383   : > { %2429 = vsyncadd (%p2275_p8), %s1975_s23, 4294967040  ;;  %s2947_s10 = sld [smem:[#allocation8_spill]]  ;;  %p22_p10 = scmp.ge.s32.totalorder %s2525_s11, 4  }
 0x384   : > { %s2948_s27 = smov %s2436_s28  ;;  %s2949_s28 = smov %s2440_s29 }
 0x385   : > { %s2951_s30 = smov %s2525_s11  ;;  %24 = sbr.rel (!%p22_p10) target bundleno = 5 (0x5), region = 111 }
 0x389   : > { %s2950_s29 = smov %s2947_s10 }
 0x38a   :  { %1988 = vsyncpa [#allocation3], 1 }
 0x38b   :  { %1990 = vsyncpa [#allocation3 + $0x1], 1 }
 0x38c   :  { %1991 = vsyncpa [#allocation4], 1 }
 0x38d   :  { %1993 = vsyncpa [#allocation4 + $0x1], 1 }

</bundles_post_ra>
